<compile_context>
chip_gen: v7x
topology: tpu7x:2x2x1
jax: 0.10.0
libtpu: 0.0.40
codegen_flags: <defaults>
</compile_context>

<pallas_src>
import math

import jax
import jax.numpy as jnp
from jax.experimental import pallas as pl
from jax.experimental.pallas import tpu as pltpu

LANE = 128


def _choose_spatial_tile(hw, n_batch, min_steps=8, max_ts=512):
    """Pick a lane-dense spatial tile TS that divides hw.

    Prefers the largest multiple-of-128 tile (<= max_ts) that still yields at
    least `min_steps` total grid steps (so v7x gets >= min_steps/2 per core and
    the pipeline has work to overlap); otherwise falls back to the smallest
    lane-dense tile (most steps).
    """
    if hw % LANE != 0:
        return hw                              # full-extent block (allowed)
    cands = [ts for ts in range(LANE, min(hw, max_ts) + 1, LANE) if hw % ts == 0]
    for ts in sorted(cands, reverse=True):
        if n_batch * (hw // ts) >= min_steps:
            return ts
    return cands[0]                            # smallest tile -> most pipeline steps


# ------------------------------ Pallas kernel --------------------------------
def _make_root_kernel(child_channels, has_residual):
    n = len(child_channels)
    offsets, off = [], 0
    for c in child_channels:
        offsets.append(off)
        off += c

    def kernel(*refs):
        xs = refs[:n]                          # each (C_i, TS) f32
        w_ref = refs[n]                        # (Cout, K_total) bf16, BN scale folded
        sh_ref = refs[n + 1]                   # (Cout, 1) f32 BN shift
        o_ref = refs[n + 2]                    # (Cout, TS) f32 output block
        xcat = refs[n + 3]                     # VMEM scratch (K_total, TS) bf16

        # Build the channel concat in VMEM; f32->bf16 cast happens in-kernel so
        # the activations are read from HBM exactly once.
        for i in range(n):
            xcat[offsets[i]:offsets[i] + child_channels[i], :] = (
                xs[i][...].astype(jnp.bfloat16))

        # One fused-K matmul; the MXU accumulates the whole K in f32.
        acc = jnp.dot(w_ref[...], xcat[...], preferred_element_type=jnp.float32)
        acc = acc + sh_ref[...]                # BN shift (lane broadcast)
        if has_residual:
            acc = acc + xs[0][...]             # residual add in full f32
        o_ref[...] = jnp.maximum(acc, 0.0)     # ReLU

    return kernel


def root_pallas(children_3d, weight, shift, out_channels, residual):
    """children_3d: list of (N, C_i, HW) f32 views of NCHW inputs.
    weight: (Cout, K_total) bf16 (BN scale folded); shift: (Cout, 1) f32."""
    n_batch, _, hw = children_3d[0].shape
    child_channels = tuple(int(c.shape[1]) for c in children_3d)
    k_total = sum(child_channels)
    ts = _choose_spatial_tile(hw, n_batch)
    grid = (n_batch, hw // ts)

    in_specs = [pl.BlockSpec((None, c, ts), lambda b, s: (b, 0, s))
                for c in child_channels]
    in_specs += [
        pl.BlockSpec((out_channels, k_total), lambda b, s: (0, 0)),  # weight (resident)
        pl.BlockSpec((out_channels, 1), lambda b, s: (0, 0)),        # shift  (resident)
    ]

    return pl.pallas_call(
        _make_root_kernel(child_channels, residual),
        out_shape=jax.ShapeDtypeStruct((n_batch, out_channels, hw), jnp.float32),
        grid=grid,
        in_specs=in_specs,
        out_specs=pl.BlockSpec((None, out_channels, ts), lambda b, s: (b, 0, s)),
        scratch_shapes=[pltpu.VMEM((k_total, ts), jnp.bfloat16)],
        compiler_params=pltpu.CompilerParams(
            dimension_semantics=("parallel", "parallel")),
    )(*children_3d, weight, shift)


# ------------------------------ Root parameters ------------------------------
def make_root_params(key, in_channels_list, out_channels, residual, kernel_size=1):
    """nn.Conv2d(sum(Cin), Cout, 1, bias=False) + BatchNorm2d(Cout); BN folded offline."""
    assert kernel_size == 1, "Root is only ever built with kernel_size=1 in DLA"
    in_total = sum(in_channels_list)
    if residual:
        assert in_channels_list[0] == out_channels
    k1, k2, k3, k4, k5 = jax.random.split(key, 5)
    w = jax.random.normal(k1, (out_channels, in_total), jnp.float32) / math.sqrt(in_total)
    gamma = 1.0 + 0.1 * jax.random.normal(k2, (out_channels,), jnp.float32)
    beta = 0.1 * jax.random.normal(k3, (out_channels,), jnp.float32)
    mean = 0.1 * jax.random.normal(k4, (out_channels,), jnp.float32)
    var = jnp.abs(jax.random.normal(k5, (out_channels,), jnp.float32)) * 0.1 + 1.0

    scale = gamma / jnp.sqrt(var + 1e-5)
    shift = beta - mean * scale

    # Offline folds: BN scale into the channel-major weight (Cout, K_total),
    # cast to bf16 for full-rate MXU; shift stays f32 for the epilogue.
    w_folded = (w * scale[:, None]).astype(jnp.bfloat16)

    return {
        "weight": w_folded,                                     # (Cout, K_total) bf16
        "shift": shift.reshape(out_channels, 1).astype(jnp.float32),  # (Cout, 1) f32
        "out_channels": out_channels,
        "in_channels": tuple(in_channels_list),
        "residual": residual,
    }


# -------------------------------- Root forward -------------------------------
def root_forward(params, *children):
    """children: NCHW tensors (same N, H, W), concatenated over channels like torch.cat."""
    assert len(children) == len(params["in_channels"])
    for c, ci in zip(children, params["in_channels"]):
        assert c.shape[1] == ci
    n, _, h, w = children[0].shape
    if params["residual"]:
        assert children[0].shape[1] == params["out_channels"]

    flats = [c.reshape(n, c.shape[1], h * w) for c in children]   # free reshape (NCHW view)
    y = root_pallas(flats, params["weight"], params["shift"],
                    params["out_channels"], params["residual"])
    return y.reshape(n, params["out_channels"], h, w)             # free reshape back to NCHW


# ----------------------------- pure-JAX reference ----------------------------
def root_reference(params, *children):
    x = jnp.concatenate(children, axis=1)                         # torch.cat(x, 1)
    x_bf = x.astype(jnp.bfloat16).astype(jnp.float32)             # match in-kernel cast
    w = params["weight"].astype(jnp.float32)                      # (Cout, K_total)
    y = jnp.einsum("oc,nchw->nohw", w, x_bf, precision="highest")
    y = y + params["shift"].reshape(1, -1, 1, 1)
    if params["residual"]:
        y = y + children[0]
    return jnp.maximum(y, 0.0)


# ------------------------------------ main ------------------------------------
if __name__ == "__main__":
    key = jax.random.PRNGKey(0)
    k1, k2, k3, kp1, kp2 = jax.random.split(key, 5)

    N, H, W = 2, 16, 16

    # Root with residual: two children (32, 16 channels) -> 32 output channels.
    c0 = jax.random.normal(k1, (N, 32, H, W), jnp.float32)
    c1 = jax.random.normal(k2, (N, 16, H, W), jnp.float32)
    p_res = make_root_params(kp1, [32, 16], 32, residual=True)

    fwd_res = jax.jit(lambda a, b: root_forward(p_res, a, b))
    y_res = jax.block_until_ready(fwd_res(c0, c1))
    assert y_res.shape == (N, 32, H, W), y_res.shape
    assert jnp.allclose(y_res, root_reference(p_res, c0, c1), atol=2e-3, rtol=2e-3)

    # Root without residual: three children (32, 16, 16 channels) -> 64 channels.
    c2 = jax.random.normal(k3, (N, 16, H, W), jnp.float32)
    p_nr = make_root_params(kp2, [32, 16, 16], 64, residual=False)

    fwd_nr = jax.jit(lambda a, b, c: root_forward(p_nr, a, b, c))
    y_nr = jax.block_until_ready(fwd_nr(c0, c1, c2))
    assert y_nr.shape == (N, 64, H, W), y_nr.shape
    assert jnp.allclose(y_nr, root_reference(p_nr, c0, c1, c2), atol=2e-3, rtol=2e-3)

    print("KERNEL_OK")
</pallas_src>

<mosaic_0001>
module attributes {stable_mosaic.version = 11 : i64} {
  func.func @kernel(%arg0: i32, %arg1: i32, %arg2: memref<1x32x128xf32, #tpu.memory_space<vmem>>, %arg3: memref<1x16x128xf32, #tpu.memory_space<vmem>>, %arg4: memref<32x48xbf16, #tpu.memory_space<vmem>>, %arg5: memref<32x1xf32, #tpu.memory_space<vmem>>, %arg6: memref<1x32x128xf32, #tpu.memory_space<vmem>>, %arg7: memref<48x128xbf16, #tpu.memory_space<vmem>>) attributes {dimension_semantics = [#tpu.dimension_semantics<parallel>, #tpu.dimension_semantics<parallel>], iteration_bounds = array<i64: 2, 2>, scalar_prefetch = 0 : i64, scratch_operands = 1 : i64, tpu.core_type = #tpu.core_type<tc>, window_params = [{transform_indices = @transform_0, window_bounds = array<i64: 1, 32, 128>}, {transform_indices = @transform_1, window_bounds = array<i64: 1, 16, 128>}, {pipeline_mode = #tpu.pipeline_mode<synchronous>, transform_indices = @transform_2, window_bounds = array<i64: 32, 48>}, {pipeline_mode = #tpu.pipeline_mode<synchronous>, transform_indices = @transform_3, window_bounds = array<i64: 32, 1>}, {transform_indices = @transform_4, window_bounds = array<i64: 1, 32, 128>}]} {
    %c0 = arith.constant 0 : index
    %c0_0 = arith.constant 0 : index
    %c0_1 = arith.constant 0 : index
    %0 = vector.load %arg2[%c0, %c0_0, %c0_1] : memref<1x32x128xf32, #tpu.memory_space<vmem>>, vector<1x32x128xf32>
    %1 = vector.shape_cast %0 : vector<1x32x128xf32> to vector<32x128xf32>
    %2 = arith.truncf %1 : vector<32x128xf32> to vector<32x128xbf16>
    %c0_2 = arith.constant 0 : index
    %c0_3 = arith.constant 0 : index
    %3 = vector.load %arg7[%c0_2, %c0_3] : memref<48x128xbf16, #tpu.memory_space<vmem>>, vector<32x128xbf16>
    tpu.vector_store %arg7[%c0_2, %c0_3], %2 {strides = array<i32>} : memref<48x128xbf16, #tpu.memory_space<vmem>>, vector<32x128xbf16>,
    %c0_4 = arith.constant 0 : index
    %c0_5 = arith.constant 0 : index
    %c0_6 = arith.constant 0 : index
    %4 = vector.load %arg3[%c0_4, %c0_5, %c0_6] : memref<1x16x128xf32, #tpu.memory_space<vmem>>, vector<1x16x128xf32>
    %5 = vector.shape_cast %4 : vector<1x16x128xf32> to vector<16x128xf32>
    %6 = arith.truncf %5 : vector<16x128xf32> to vector<16x128xbf16>
    %c32 = arith.constant 32 : index
    %c0_7 = arith.constant 0 : index
    %7 = vector.load %arg7[%c32, %c0_7] : memref<48x128xbf16, #tpu.memory_space<vmem>>, vector<16x128xbf16>
    tpu.vector_store %arg7[%c32, %c0_7], %6 {strides = array<i32>} : memref<48x128xbf16, #tpu.memory_space<vmem>>, vector<16x128xbf16>,
    %c0_8 = arith.constant 0 : index
    %c0_9 = arith.constant 0 : index
    %8 = vector.load %arg4[%c0_8, %c0_9] : memref<32x48xbf16, #tpu.memory_space<vmem>>, vector<32x48xbf16>
    %c0_10 = arith.constant 0 : index
    %c0_11 = arith.constant 0 : index
    %9 = vector.load %arg7[%c0_10, %c0_11] : memref<48x128xbf16, #tpu.memory_space<vmem>>, vector<48x128xbf16>
    %cst = arith.constant dense<0.000000e+00> : vector<32x128xf32>
    %10 = tpu.matmul %8, %9, %cst {dimension_numbers = #tpu.dot_dimension_numbers<[1], [0], [0], [1], [0, 0, 1, 1], [], []>} : vector<32x48xbf16>, vector<48x128xbf16>, vector<32x128xf32> -> vector<32x128xf32>
    %c0_12 = arith.constant 0 : index
    %c0_13 = arith.constant 0 : index
    %11 = vector.load %arg5[%c0_12, %c0_13] : memref<32x1xf32, #tpu.memory_space<vmem>>, vector<32x1xf32>
    %12 = vector.broadcast %11 : vector<32x1xf32> to vector<32x128xf32>
    %13 = arith.addf %10, %12 : vector<32x128xf32>
    %c0_14 = arith.constant 0 : index
    %c0_15 = arith.constant 0 : index
    %c0_16 = arith.constant 0 : index
    %14 = vector.load %arg2[%c0_14, %c0_15, %c0_16] : memref<1x32x128xf32, #tpu.memory_space<vmem>>, vector<1x32x128xf32>
    %15 = vector.shape_cast %14 : vector<1x32x128xf32> to vector<32x128xf32>
    %16 = arith.addf %13, %15 : vector<32x128xf32>
    %cst_17 = arith.constant 0.000000e+00 : f32
    %17 = vector.broadcast %cst_17 : f32 to vector<32x128xf32>
    %18 = arith.maximumf %16, %17 : vector<32x128xf32>
    %c0_18 = arith.constant 0 : index
    %c0_19 = arith.constant 0 : index
    %c0_20 = arith.constant 0 : index
    %19 = vector.load %arg6[%c0_18, %c0_19, %c0_20] : memref<1x32x128xf32, #tpu.memory_space<vmem>>, vector<1x32x128xf32>
    %20 = vector.shape_cast %19 : vector<1x32x128xf32> to vector<32x128xf32>
    %21 = vector.shape_cast %18 : vector<32x128xf32> to vector<1x32x128xf32>
    tpu.vector_store %arg6[%c0_18, %c0_19, %c0_20], %21 {strides = array<i32>} : memref<1x32x128xf32, #tpu.memory_space<vmem>>, vector<1x32x128xf32>,
    return
  }
  func.func @transform_0(%arg0: i32, %arg1: i32) -> (i32, i32, i32) {
    %c0_i32 = arith.constant 0 : i32
    %c0_i32_0 = arith.constant 0 : i32
    return %arg0, %c0_i32, %arg1 : i32, i32, i32
  }
  func.func @transform_1(%arg0: i32, %arg1: i32) -> (i32, i32, i32) {
    %c0_i32 = arith.constant 0 : i32
    %c0_i32_0 = arith.constant 0 : i32
    return %arg0, %c0_i32, %arg1 : i32, i32, i32
  }
  func.func @transform_2(%arg0: i32, %arg1: i32) -> (i32, i32) {
    %c0_i32 = arith.constant 0 : i32
    %c0_i32_0 = arith.constant 0 : i32
    %c0_i32_1 = arith.constant 0 : i32
    return %c0_i32, %c0_i32_0 : i32, i32
  }
  func.func @transform_3(%arg0: i32, %arg1: i32) -> (i32, i32) {
    %c0_i32 = arith.constant 0 : i32
    %c0_i32_0 = arith.constant 0 : i32
    %c0_i32_1 = arith.constant 0 : i32
    return %c0_i32, %c0_i32_0 : i32, i32
  }
  func.func @transform_4(%arg0: i32, %arg1: i32) -> (i32, i32, i32) {
    %c0_i32 = arith.constant 0 : i32
    %c0_i32_0 = arith.constant 0 : i32
    return %arg0, %c0_i32, %arg1 : i32, i32, i32
  }
}

</mosaic_0001>

<bundles_post_ra>
// kernel: _lambda_.1
= control target key start
LH: loop header
LB: loop body
LE: loop exit
PB: predicated region body
PF: predicated region fallthrough
CT: control target
= control target key end

     0   :  { %s772_s15 = smov 0   ;;  %s774_s16 = smov 0   ;;  %s906_s0 = inlined_call_operand.vmem [shape: f32[2,32,256], index: 0, kind: input, shape index: {}]   ;;  %s907_s1 = inlined_call_operand.vmem [shape: f32[2,16,256], index: 1, kind: input, shape index: {}]   ;;  %s908_s2 = inlined_call_operand.vmem [shape: bf16[32,48], index: 2, kind: input, shape index: {}]   ;;  %s909_s3 = inlined_call_operand.vmem [shape: f32[32,1], index: 3, kind: input, shape index: {}]   ;;  %s910_s4 = inlined_call_operand.vmem [shape: f32[2,32,256], index: 4, kind: output, shape index: {}]  }
   0x1   :  { %s776_s17 = smov 0   ;;  %s778_s18 = smov 0  }
   0x2   :  { %s780_s19 = smov 0   ;;  %s782_s20 = smov 0  }
   0x3   :  { %s784_s21 = smov 0  }
   0x4 LB: > { %s23_s22 = sadd.s32 1, %s736_s19  ;;  %s26_s23 = sadd.s32 1, %s740_s20  ;;  %s744_s21 = sphi %s784_s21, %s14_s21   ;;  %s740_s20 = sphi %s782_s20, %s918_s20   ;;  %s736_s19 = sphi %s780_s19, %s917_s19   ;;  %s732_s18 = sphi %s778_s18, %s916_s18   ;;  %s728_s17 = sphi %s776_s17, %s915_s17   ;;  %s724_s16 = sphi %s774_s16, %s914_s16   ;;  %s720_s15 = sphi %s772_s15, %s913_s15  }
   0x5   : > { %p24_p0 = scmp.ge.s32.totalorder %s23_s22, 2  ;;  %s591_s24 = sadd.s32 4294967295, %s744_s21  }
   0x6   : > { %p42_p1 = scmp.ne.s32.totalorder %s724_s16, %s720_s15  ;;  %p43_p2 = scmp.eq.s32.totalorder %s744_s21, 0 }
   0x7   : > { %s920_s22 = smov (%p24_p0, %s23_s22), 0  ;;  %s922_s23 = smov (!%p24_p0, %s26_s23), %s740_s20 }
   0x8   : > { %p28_p3 = scmp.ge.s32.totalorder %s922_s23, 2  ;;  %p144_p4 = scmp.eq.s32.totalorder %s591_s24, 3 }
   0x9   : > { %s31_s25 = ssub.s32 %s736_s19, %s920_s22  ;;  %p818_p5 = por %p43_p2, %p42_p1 }
   0xa   : > { %s924_s23 = smov (%p28_p3, %s922_s23), 0  ;;  %p824_p6 = por %p144_p4, %p42_p1 }
   0xb   : > { %s30_s28 = ssub.s32 %s740_s20, %s924_s23  ;;  %s35_s30 = sadd.s32 1, %s724_s16 }
   0xc   : > { %s32_s29 = sor.u32 %s31_s25, %s30_s28  ;;  %p594_p8 = scmp.ge.s32.totalorder %s744_s21, 4 }
   0xd   : > { %p33_p7 = scmp.eq.s32.totalorder %s32_s29, 0 }
   0xe   : > { %172 = sbr.rel (%p594_p8) target bundleno = 36 (0x24), region = 24 }
   0xf   : > { %s832_s5 = scalar_select %p33_p7, %s724_s16, %s35_s30  }
  0x15   : > { %175 = sbr.rel (!%p818_p5) target bundleno = 29 (0x1d), region = 28  ;;  %s177_s6 = sand.u32 (%p818_p5), 1, %s724_s16  }
  0x16   : > { %s596_s7 = sshll.u32 (%p818_p5), %s740_s20, 3  ;;  %s595_s8 = sshll.u32 (%p818_p5), %s177_s6, 5 }
  0x17   : > { %s181_s9 = sadd.s32 (%p818_p5), %s736_s19, %s596_s7  ;;  %s179_s14 = scalar_lea.vmem (%p818_p5), [#allocation3], %s595_s8 }
  0x18   : > { %s597_s10 = sshll.u32 (%p818_p5), %s181_s9, 3 }
  0x19   : > { %s183_s13 = scalar_lea.vmem (%p818_p5), %s906_s0, %s597_s10 }
  0x1a   : > { %v217_v0 = vld [vmem:[%s183_s13] sm:$0xff] (%p818_p5)  ;;  %v219_v1 = vld [vmem:[%s183_s13 + $0x10] sm:$0xff] (%p818_p5) }
  0x1b   : > { %v221_v2 = vld [vmem:[%s183_s13 + $0x20] sm:$0xff] (%p818_p5)  ;;  %218 = vst [vmem:[%s179_s14] sm:$0xff] (%p818_p5), %v217_v0  ;;  %220 = vst [vmem:[%s179_s14 + $0x8] sm:$0xff] (%p818_p5), %v219_v1  ;;  %v223_v3 = vld [vmem:[%s183_s13 + $0x30] sm:$0xff] (%p818_p5) }
  0x1c   : > { %222 = vst [vmem:[%s179_s14 + $0x10] sm:$0xff] %v221_v2  ;;  %224 = vst [vmem:[%s179_s14 + $0x18] sm:$0xff] %v223_v3 }
  0x1d PF: > { %230 = sbr.rel (!%p818_p5) target bundleno = 36 (0x24), region = 66  ;;  %s232_s24 = sand.u32 (%p818_p5), 1, %s724_s16  }
  0x1e   : > { %s599_s25 = sshll.u32 (%p818_p5), %s740_s20, 2  ;;  %s598_s28 = sshll.u32 (%p818_p5), %s232_s24, 4 }
  0x1f   : > { %s236_s29 = sadd.s32 (%p818_p5), %s736_s19, %s599_s25  ;;  %s234_s9 = scalar_lea.vmem (%p818_p5), [#allocation4], %s598_s28 }
  0x20   : > { %s600_s30 = sshll.u32 (%p818_p5), %s236_s29, 3 }
  0x21   : > { %s238_s8 = scalar_lea.vmem (%p818_p5), %s907_s1, %s600_s30 }
  0x22   : > { %v268_v4 = vld [vmem:[%s238_s8] sm:$0xff] (%p818_p5)  ;;  %v270_v5 = vld [vmem:[%s238_s8 + $0x10] sm:$0xff] (%p818_p5) }
  0x23   : > { %269 = vst [vmem:[%s234_s9] sm:$0xff] (%p818_p5), %v268_v4  ;;  %271 = vst [vmem:[%s234_s9 + $0x8] sm:$0xff] (%p818_p5), %v270_v5 }
  0x24 PF: > { %p601_p9 = scmp.ge.s32.totalorder %s744_s21, 1  ;;  %p276_p10 = scmp.lt.s32.totalorder %s744_s21, 5 }
  0x26   : > { %p277_p11 = pnand %p601_p9, %p276_p10 }
  0x27   : > { %s283_s26 = sand.u32 (!%p277_p11), 1, %s720_s15   ;;  %v688_v6 = vld [vmem:[%s908_s2] sm:$0xff] (!%p277_p11)   ;;  %vm372_vm0 = vcmask (!%p277_p11), 392192   ;;  %v340_v7 = vld [vmem:[%s909_s3 + $0x10] sm:$0xff] (!%p277_p11)  ;;  %v746_v11 = vmov (!%p277_p11), 0   ;;  %v341_v18 = vld [vmem:[%s909_s3 + $0x18] sm:$0xff] (!%p277_p11) }
  0x28   : > { %280 = sbr.rel (%p277_p11) target bundleno = 287 (0x11f), region = 104  ;;  %s857_s12 = sshll.u32 (!%p277_p11), %s283_s26, 5  ;;  %625 = vmatprep.mubr.msk.bf16.mxu0 (!%p277_p11), %vm372_vm0, %v688_v6  ;;  %687 = vset.pattern.permute.xlu1 (!%p277_p11), %v746_v11  ;;  %v338_v17 = vld [vmem:[%s909_s3] sm:$0xff] (!%p277_p11)  ;;  %v339_v19 = vld [vmem:[%s909_s3 + $0x8] sm:$0xff] (!%p277_p11) }
  0x29   : > { %s603_s13 = sshll.u32 (!%p277_p11), %s283_s26, 4  ;;  %s285_s25 = scalar_lea.vmem (!%p277_p11), [#allocation3], %s857_s12  ;;  %686 = vset.pattern.permute.xlu0 (!%p277_p11), %v746_v11  ;;  %354 = vperm.xlu1 (!%p277_p11), %687, %v340_v7   ;;  %v689_v21 = vld [vmem:[%s908_s2 + $0x8] sm:$0xff] (!%p277_p11)  }
  0x2a   : > { %v319_v8 = vld [vmem:[%s285_s25] sm:$0xff] (!%p277_p11)  ;;  %v320_v9 = vld [vmem:[%s285_s25 + $0x8] sm:$0xff] (!%p277_p11)  ;;  %v321_v10 = vld [vmem:[%s285_s25 + $0x10] sm:$0xff] (!%p277_p11)  ;;  %s292_s15 = scalar_lea.vmem (!%p277_p11), [#allocation4], %s603_s13  ;;  %344 = vperm.xlu0 (!%p277_p11), %686, %v338_v17   ;;  %s317_s10 = scalar_lea.vmem (!%p277_p11), [#allocation5], %s857_s12 }
  0x2b   : > { %v323_v12 = vpack.c.bf16 (!%p277_p11), %v320_v9, %v319_v8  ;;  %v322_v13 = vld [vmem:[%s285_s25 + $0x18] sm:$0xff] (!%p277_p11)  ;;  %v327_v14 = vld [vmem:[%s292_s15] sm:$0xff] (!%p277_p11) }
  0x2c   : > { %v324_v15 = vpack.c.bf16 (!%p277_p11), %v322_v13, %v321_v10  ;;  %v328_v16 = vld [vmem:[%s292_s15 + $0x8] sm:$0xff] (!%p277_p11) }
  0x2d   : > { %619 = vmatprep.subr.bf16.mxu0 (!%p277_p11), %v323_v12  ;;  %v329_v20 = vpack.c.bf16 (!%p277_p11), %v328_v16, %v327_v14  ;;  %359 = vperm.xlu1 (!%p277_p11), %687, %v341_v18  }
  0x2e   : > { %620 = vmatpush3.bf16.msra.mxu0 (!%p277_p11), %v323_v12  ;;  %349 = vperm.xlu0 (!%p277_p11), %686, %v339_v19  }
  0x2f   : > { %621 = vmatprep.subr.bf16.mxu0 %v324_v15  ;;  %s610_s11 = sshll.u32 (%p824_p6), %s732_s18, 3 }
  0x30   : > { %s452_s13 = sadd.s32 (%p824_p6), %s728_s17, %s610_s11 }
  0x31   : > { %s611_s14 = sshll.u32 (%p824_p6), %s452_s13, 3 }
  0x32   : > { %622 = vmatpush3.bf16.msra.mxu0 %v324_v15  ;;  %s454_s25 = scalar_lea.vmem (%p824_p6), %s910_s4, %s611_s14 }
  0x33   : > { %623 = vmatprep.subr.bf16.mxu0 %v329_v20 }
  0x36   : > { %624 = vmatpush3.bf16.msra.mxu0 %v329_v20 }
  0x39   : > { %626 = vmatmul.mubr.msk.bf16.vlgmr.msra.gmra.mrb[0].mxu0 %vm372_vm0, %v689_v21 }
  0xa8   : > { %v355_v22 = vpop.permute.xlu1 %354 }
  0xa9   : > { %v345_v23 = vpop.permute.xlu0 %344 }
  0xac   : > { %v360_v27 = vpop.permute.xlu1 %359 }
  0xad   : > { %v350_v30 = vpop.permute.xlu0 %349 }
 0x10c   : > { %v627_v24 = vpop.f32.mrb[0].mxu0 }
 0x10d   : > { %v422_v25 = vadd.f32 %v627_v24, %v355_v22  ;;  %v413_v26 = vpop.f32.mrb[1].mxu0 }
 0x10e   : > { %v414_v28 = vadd.f32 %v413_v26, %v345_v23  ;;  %v628_v29 = vpop.f32.mrb[2].mxu0 }
 0x10f   : > { %v434_v31 = vadd.f32 %v422_v25, %v321_v10  ;;  %v425_v32 = vadd.f32 %v628_v29, %v360_v27  ;;  %v416_v33 = vpop.f32.mrb[3].mxu0 }
 0x110   : > { %v432_v34 = vadd.f32 %v414_v28, %v319_v8  ;;  %v417_v35 = vadd.f32 %v416_v33, %v350_v30  ;;  %450 = sbr.rel (!%p824_p6) target bundleno = 287 (0x11f), region = 116 }
 0x111   : > { %v438_v36 = vmax.f32 %v434_v31, 0.0  ;;  %v435_v37 = vadd.f32 %v425_v32, %v322_v13 }
 0x112   : > { %v436_v38 = vmax.f32 %v432_v34, 0.0  ;;  %v433_v39 = vadd.f32 %v417_v35, %v320_v9 }
 0x113   : > { %442 = vst [vmem:[%s317_s10 + $0x10] sm:$0xff] %v438_v36  ;;  %v439_v40 = vmax.f32 %v435_v37, 0.0 }
 0x114   : > { %440 = vst [vmem:[%s317_s10] sm:$0xff] %v436_v38  ;;  %v437_v41 = vmax.f32 %v433_v39, 0.0 }
 0x115   : > { %443 = vst [vmem:[%s317_s10 + $0x18] sm:$0xff] %v439_v40 }
 0x116   : > { %441 = vst [vmem:[%s317_s10 + $0x8] sm:$0xff] %v437_v41 }
 0x11a   : > { %v492_v44 = vld [vmem:[%s317_s10 + $0x10] sm:$0xff] }
 0x11b   : > { %v488_v42 = vld [vmem:[%s317_s10] sm:$0xff]  ;;  %493 = vst [vmem:[%s454_s25 + $0x20] sm:$0xff] %v492_v44 }
 0x11c   : > { %v494_v45 = vld [vmem:[%s317_s10 + $0x18] sm:$0xff]  ;;  %489 = vst [vmem:[%s454_s25] sm:$0xff] %v488_v42 }
 0x11d   : > { %v490_v43 = vld [vmem:[%s317_s10 + $0x8] sm:$0xff]  ;;  %495 = vst [vmem:[%s454_s25 + $0x30] sm:$0xff] %v494_v45 }
 0x11e   : > { %491 = vst [vmem:[%s454_s25 + $0x10] sm:$0xff] %v490_v43 }
 0x11f PF: > { %s14_s21 = sadd.s32 1, %s744_s21   ;;  %s913_s15 = smov %s724_s16 }
 0x120   : > { %p11_p12 = scmp.ge.s32.totalorder %s14_s21, 6   ;;  %s914_s16 = smov %s832_s5 }
 0x121   : > { %s915_s17 = smov %s736_s19  ;;  %s916_s18 = smov %s740_s20 }
 0x122   : > { %s917_s19 = smov %s920_s22  ;;  %s918_s20 = smov %s924_s23 }
 0x123   :  { %13 = sbr.rel (!%p11_p12) target bundleno = 4 (0x4), region = 193 }

</bundles_post_ra>
